<compile_context>
chip_gen: v7x
topology: tpu7x:2x2x1
jax: 0.10.0
libtpu: 0.0.40
codegen_flags: <defaults>
</compile_context>

<pallas_src>
import jax
import jax.numpy as jnp
from jax.experimental import pallas as pl
from jax.experimental.pallas import tpu as pltpu


def rbf_random_kernel(x_ref, c_ref, x2_ref, c2_ref, w_ref, o_ref):
    # x_ref: (TB, IN), c_ref: (TO, IN), x2_ref: (TB, 1),
    # c2_ref: (1, TO), w_ref: (1, TO) [already divided by 3], o_ref: (TB, TO)
    x = x_ref[...].astype(jnp.float32)
    c = c_ref[...].astype(jnp.float32)

    # Pairwise squared distance via MXU: ||x - c||^2 = ||x||^2 + ||c||^2 - 2 x.c
    cross = jnp.dot(x, c.T, preferred_element_type=jnp.float32)      # (TB, TO)
    d2 = jnp.maximum(x2_ref[...] + c2_ref[...] - 2.0 * cross, 0.0)
    d = jnp.sqrt(d2)

    # (1 - d)^6 * (35 d^2 + 18 d + 3) / 3 ; the 1/3 is folded into w_ref.
    om = 1.0 - d
    om2 = om * om
    om6 = om2 * om2 * om2
    rbf = om6 * (35.0 * d * d + 18.0 * d + 3.0)

    o_ref[...] = (rbf * w_ref[...]).astype(o_ref.dtype)


def _pick_tile(dim, cap, unit):
    """Largest divisor t of dim with t <= cap and (t % unit == 0 or t == dim)."""
    if dim <= cap:
        return dim
    for t in range(cap, 0, -1):
        if dim % t == 0 and t % unit == 0:
            return t
    return dim  # fall back to the full (untiled) dimension


def rbf_random_forward(x, centers, weights, *, tb=None, to=None):
    """x: (B, IN), centers: (OUT, IN), weights: (OUT,) -> (B, OUT)."""
    B, IN = x.shape
    OUT, IN2 = centers.shape
    assert IN == IN2

    # Big tiles by default (sweepable): batch tile up to 256, output tile up
    # to 512, respecting the (8, 128) tiling constraint / full-dim exception.
    if tb is None:
        tb = _pick_tile(B, 256, 8)
    if to is None:
        to = _pick_tile(OUT, 512, 128)
    assert B % tb == 0 and OUT % to == 0
    assert (tb % 8 == 0 or tb == B) and (to % 128 == 0 or to == OUT)

    # Hoisted, one-time precomputation (removes XLU reductions from the hot loop).
    x2 = jnp.sum(x.astype(jnp.float32) * x.astype(jnp.float32),
                 axis=1, keepdims=True)                               # (B, 1)
    c2 = jnp.sum(centers.astype(jnp.float32) * centers.astype(jnp.float32),
                 axis=1)[None, :]                                     # (1, OUT)
    w_scaled = (weights.astype(jnp.float32) / 3.0).reshape(1, OUT)    # (1, OUT)

    # VMEM budget: double-buffered tiles for every operand + output, plus slack.
    elt = 4
    needed = 2 * elt * (tb * IN + to * IN + tb * to + tb + 2 * to) + (2 << 20)
    vmem_limit = int(min(max(needed, 32 << 20), 64 << 20))

    return pl.pallas_call(
        rbf_random_kernel,
        out_shape=jax.ShapeDtypeStruct((B, OUT), x.dtype),
        grid_spec=pltpu.PrefetchScalarGridSpec(
            num_scalar_prefetch=0,
            grid=(B // tb, OUT // to),
            in_specs=[
                pl.BlockSpec((tb, IN), lambda i, j: (i, 0)),   # x tile
                pl.BlockSpec((to, IN), lambda i, j: (j, 0)),   # centers tile
                pl.BlockSpec((tb, 1), lambda i, j: (i, 0)),    # ||x||^2 tile
                pl.BlockSpec((1, to), lambda i, j: (0, j)),    # ||c||^2 tile
                pl.BlockSpec((1, to), lambda i, j: (0, j)),    # weights/3 tile
            ],
            out_specs=pl.BlockSpec((tb, to), lambda i, j: (i, j)),
        ),
        compiler_params=pltpu.CompilerParams(
            dimension_semantics=("parallel", "parallel"),
            vmem_limit_bytes=vmem_limit,
        ),
    )(x, centers, x2, c2, w_scaled)


def rbf_random_reference(x, centers, weights):
    # Pure-JAX reference mirroring the PyTorch forward exactly.
    diff = x[:, None, :] - centers[None, :, :]                 # (B, OUT, IN)
    d = jnp.sqrt(jnp.sum(diff * diff, axis=2))                 # (B, OUT)
    rbf = (1.0 - d) ** 6 * (35.0 * d * d + 18.0 * d + 3.0) / 3.0
    return rbf * weights[None, :]


if __name__ == "__main__":
    in_features = 32
    out_features = 256
    batch = 64

    key = jax.random.PRNGKey(0)
    kx, kc, kw = jax.random.split(key, 3)

    # Deterministic "parameters" (uniform(-1, 1) as in reset_parameters).
    centers = jax.random.uniform(kc, (out_features, in_features),
                                 dtype=jnp.float32, minval=-1.0, maxval=1.0)
    weights = jax.random.uniform(kw, (out_features,),
                                 dtype=jnp.float32, minval=-1.0, maxval=1.0)
    x = jax.random.normal(kx, (batch, in_features), dtype=jnp.float32)

    ref = rbf_random_reference(x, centers, weights)

    # Default (large-tile) configuration: grid collapses to (1, 1) here.
    out = jax.block_until_ready(rbf_random_forward(x, centers, weights))
    assert out.shape == (batch, out_features)
    assert jnp.allclose(out, ref, rtol=1e-3, atol=1e-3), "mismatch vs reference"

    # Smaller explicit tiles to exercise a multi-step grid / the index maps.
    out2 = jax.block_until_ready(
        rbf_random_forward(x, centers, weights, tb=16, to=128))
    assert jnp.allclose(out2, ref, rtol=1e-3, atol=1e-3), "tiled mismatch"

    print("KERNEL_OK")
</pallas_src>

<mosaic_0001>
module attributes {stable_mosaic.version = 11 : i64} {
  func.func @rbf_random_kernel(%arg0: i32, %arg1: i32, %arg2: memref<64x32xf32, #tpu.memory_space<vmem>>, %arg3: memref<256x32xf32, #tpu.memory_space<vmem>>, %arg4: memref<64x1xf32, #tpu.memory_space<vmem>>, %arg5: memref<1x256xf32, #tpu.memory_space<vmem>>, %arg6: memref<1x256xf32, #tpu.memory_space<vmem>>, %arg7: memref<64x256xf32, #tpu.memory_space<vmem>>) attributes {dimension_semantics = [#tpu.dimension_semantics<parallel>, #tpu.dimension_semantics<parallel>], iteration_bounds = array<i64: 1, 1>, scalar_prefetch = 0 : i64, scratch_operands = 0 : i64, tpu.core_type = #tpu.core_type<tc>, window_params = [{transform_indices = @transform_0, window_bounds = array<i64: 64, 32>}, {transform_indices = @transform_1, window_bounds = array<i64: 256, 32>}, {transform_indices = @transform_2, window_bounds = array<i64: 64, 1>}, {transform_indices = @transform_3, window_bounds = array<i64: 1, 256>}, {transform_indices = @transform_4, window_bounds = array<i64: 1, 256>}, {transform_indices = @transform_5, window_bounds = array<i64: 64, 256>}]} {
    %c0 = arith.constant 0 : index
    %c0_0 = arith.constant 0 : index
    %0 = vector.load %arg2[%c0, %c0_0] : memref<64x32xf32, #tpu.memory_space<vmem>>, vector<64x32xf32>
    %c0_1 = arith.constant 0 : index
    %c0_2 = arith.constant 0 : index
    %1 = vector.load %arg3[%c0_1, %c0_2] : memref<256x32xf32, #tpu.memory_space<vmem>>, vector<256x32xf32>
    %2 = tpu.transpose %1, [1, 0] : vector<256x32xf32> -> vector<32x256xf32>
    %cst = arith.constant dense<0.000000e+00> : vector<64x256xf32>
    %3 = tpu.matmul %0, %2, %cst {dimension_numbers = #tpu.dot_dimension_numbers<[1], [0], [0], [1], [0, 0, 1, 1], [], []>} : vector<64x32xf32>, vector<32x256xf32>, vector<64x256xf32> -> vector<64x256xf32>
    %c0_3 = arith.constant 0 : index
    %c0_4 = arith.constant 0 : index
    %4 = vector.load %arg4[%c0_3, %c0_4] : memref<64x1xf32, #tpu.memory_space<vmem>>, vector<64x1xf32>
    %c0_5 = arith.constant 0 : index
    %c0_6 = arith.constant 0 : index
    %5 = vector.load %arg5[%c0_5, %c0_6] : memref<1x256xf32, #tpu.memory_space<vmem>>, vector<1x256xf32>
    %6 = vector.broadcast %4 : vector<64x1xf32> to vector<64x256xf32>
    %7 = vector.broadcast %5 : vector<1x256xf32> to vector<64x256xf32>
    %8 = arith.addf %6, %7 : vector<64x256xf32>
    %cst_7 = arith.constant 2.000000e+00 : f32
    %9 = vector.broadcast %cst_7 : f32 to vector<64x256xf32>
    %10 = arith.mulf %9, %3 : vector<64x256xf32>
    %11 = arith.subf %8, %10 : vector<64x256xf32>
    %cst_8 = arith.constant 0.000000e+00 : f32
    %12 = vector.broadcast %cst_8 : f32 to vector<64x256xf32>
    %13 = arith.maximumf %11, %12 : vector<64x256xf32>
    %14 = math.sqrt %13 : vector<64x256xf32>
    %cst_9 = arith.constant 1.000000e+00 : f32
    %15 = vector.broadcast %cst_9 : f32 to vector<64x256xf32>
    %16 = arith.subf %15, %14 : vector<64x256xf32>
    %17 = arith.mulf %16, %16 : vector<64x256xf32>
    %18 = arith.mulf %17, %17 : vector<64x256xf32>
    %19 = arith.mulf %18, %17 : vector<64x256xf32>
    %cst_10 = arith.constant 3.500000e+01 : f32
    %20 = vector.broadcast %cst_10 : f32 to vector<64x256xf32>
    %21 = arith.mulf %20, %14 : vector<64x256xf32>
    %22 = arith.mulf %21, %14 : vector<64x256xf32>
    %cst_11 = arith.constant 1.800000e+01 : f32
    %23 = vector.broadcast %cst_11 : f32 to vector<64x256xf32>
    %24 = arith.mulf %23, %14 : vector<64x256xf32>
    %25 = arith.addf %22, %24 : vector<64x256xf32>
    %cst_12 = arith.constant 3.000000e+00 : f32
    %26 = vector.broadcast %cst_12 : f32 to vector<64x256xf32>
    %27 = arith.addf %25, %26 : vector<64x256xf32>
    %28 = arith.mulf %19, %27 : vector<64x256xf32>
    %c0_13 = arith.constant 0 : index
    %c0_14 = arith.constant 0 : index
    %29 = vector.load %arg6[%c0_13, %c0_14] : memref<1x256xf32, #tpu.memory_space<vmem>>, vector<1x256xf32>
    %30 = vector.broadcast %29 : vector<1x256xf32> to vector<64x256xf32>
    %31 = arith.mulf %28, %30 : vector<64x256xf32>
    %c0_15 = arith.constant 0 : index
    %c0_16 = arith.constant 0 : index
    %32 = vector.load %arg7[%c0_15, %c0_16] : memref<64x256xf32, #tpu.memory_space<vmem>>, vector<64x256xf32>
    tpu.vector_store %arg7[%c0_15, %c0_16], %31 {strides = array<i32>} : memref<64x256xf32, #tpu.memory_space<vmem>>, vector<64x256xf32>,
    return
  }
  func.func @transform_0(%arg0: i32, %arg1: i32) -> (i32, i32) {
    %c0_i32 = arith.constant 0 : i32
    %c0_i32_0 = arith.constant 0 : i32
    return %arg0, %c0_i32 : i32, i32
  }
  func.func @transform_1(%arg0: i32, %arg1: i32) -> (i32, i32) {
    %c0_i32 = arith.constant 0 : i32
    %c0_i32_0 = arith.constant 0 : i32
    return %arg1, %c0_i32 : i32, i32
  }
  func.func @transform_2(%arg0: i32, %arg1: i32) -> (i32, i32) {
    %c0_i32 = arith.constant 0 : i32
    %c0_i32_0 = arith.constant 0 : i32
    return %arg0, %c0_i32 : i32, i32
  }
  func.func @transform_3(%arg0: i32, %arg1: i32) -> (i32, i32) {
    %c0_i32 = arith.constant 0 : i32
    %c0_i32_0 = arith.constant 0 : i32
    return %c0_i32, %arg1 : i32, i32
  }
  func.func @transform_4(%arg0: i32, %arg1: i32) -> (i32, i32) {
    %c0_i32 = arith.constant 0 : i32
    %c0_i32_0 = arith.constant 0 : i32
    return %c0_i32, %arg1 : i32, i32
  }
  func.func @transform_5(%arg0: i32, %arg1: i32) -> (i32, i32) {
    %c0_i32 = arith.constant 0 : i32
    return %arg0, %arg1 : i32, i32
  }
}

</mosaic_0001>

<bundles_post_ra>
// kernel: tpu_custom_call.1
= control target key start
LH: loop header
LB: loop body
LE: loop exit
PB: predicated region body
PF: predicated region fallthrough
CT: control target
= control target key end

     0   :  { %vm61_vm0 = vcmask 261120   ;;  %v965_v7 = vmov 0   ;;  %s1517_s0 = inlined_call_operand.vmem [shape: f32[64,32], index: 0, kind: input, shape index: {}]   ;;  %s1518_s1 = inlined_call_operand.vmem [shape: f32[256,32], index: 1, kind: input, shape index: {}]   ;;  %s1519_s2 = inlined_call_operand.vmem [shape: f32[64,1], index: 2, kind: input, shape index: {}]   ;;  %s1520_s3 = inlined_call_operand.vmem [shape: f32[1,256], index: 3, kind: input, shape index: {}]   ;;  %s1521_s4 = inlined_call_operand.vmem [shape: f32[1,256], index: 4, kind: input, shape index: {}]   ;;  %s1522_s5 = inlined_call_operand.hbm [shape: f32[64,256], index: 5, kind: output, shape index: {}]  }
   0x1   :  { %v45_v0 = vld [vmem:[%s1518_s1 + $0x80] sm:$0xff]  ;;  %v46_v1 = vld [vmem:[%s1518_s1 + $0x88] sm:$0xff]  ;;  %vm1010_vm1 = vmpackc.low %vm61_vm0, %vm61_vm0  ;;  %908 = vset.pattern.permute.xlu1 %v965_v7  ;;  %907 = vset.pattern.permute.xlu0 %v965_v7 }
   0x2   :  { %v29_v2 = vld [vmem:[%s1518_s1] sm:$0xff]  ;;  %v839_v3 = vpack.c.bf16 %v46_v1, %v45_v0  ;;  %v30_v5 = vld [vmem:[%s1518_s1 + $0x8] sm:$0xff]  ;;  %v47_v6 = vld [vmem:[%s1518_s1 + $0x90] sm:$0xff] }
   0x3   :  { %v842_v8 = vpack.c.bf16 %v30_v5, %v29_v2  ;;  %v48_v9 = vld [vmem:[%s1518_s1 + $0x98] sm:$0xff]  ;;  %v31_v11 = vld [vmem:[%s1518_s1 + $0x10] sm:$0xff]  ;;  %v49_v13 = vld [vmem:[%s1518_s1 + $0xa0] sm:$0xff] }
   0x4   :  { %841 = vmatprep.subr.msk.bf16.mxu0 %vm1010_vm1, %v839_v3  ;;  %887 = vmatprep.subr.msk.bf16.mxu1 %vm1010_vm1, %v839_v3  ;;  %v845_v10 = vpack.c.bf16 %v48_v9, %v47_v6  ;;  %v32_v12 = vld [vmem:[%s1518_s1 + $0x18] sm:$0xff]  ;;  %v50_v14 = vld [vmem:[%s1518_s1 + $0xa8] sm:$0xff]  ;;  %v1050_v17 = vld [vmem:[%s1517_s0] sm:$0xff] }
   0x5   :  { %844 = vmatpush3.bf16.xpose.msk.msra.mxu0 %vm1010_vm1, %v842_v8  ;;  %895 = vmatpush3.bf16.xpose.msk.msra.mxu1 %vm1010_vm1, %v842_v8  ;;  %v848_v15 = vpack.c.bf16 %v32_v12, %v31_v11  ;;  %v851_v16 = vpack.c.bf16 %v50_v14, %v49_v13  ;;  %v1055_v18 = vld [vmem:[%s1517_s0 + $0x20] sm:$0xff]  ;;  %v34_v20 = vld [vmem:[%s1518_s1 + $0x28] sm:$0xff]  ;;  %v297_v21 = vld [vmem:[%s1519_s2 + $0x10] sm:$0xff] }
   0x6   :  { %847 = vmatprep.subr.msk.bf16.mxu0 %vm1010_vm1, %v845_v10  ;;  %888 = vmatprep.subr.msk.bf16.mxu1 %vm1010_vm1, %v845_v10  ;;  %v33_v19 = vld [vmem:[%s1518_s1 + $0x20] sm:$0xff]  ;;  %v51_v22 = vld [vmem:[%s1518_s1 + $0xb0] sm:$0xff]  ;;  %v52_v23 = vld [vmem:[%s1518_s1 + $0xb8] sm:$0xff] }
   0x7   :  { %823 = vmatprep.mubr.msk.f32.mxu0 %vm61_vm0, %v1050_v17  ;;  %831 = vmatprep.mubr.msk.f32.mxu1 %vm61_vm0, %v1055_v18  ;;  %v295_v24 = vld [vmem:[%s1519_s2] sm:$0xff]  ;;  %v854_v25 = vpack.c.bf16 %v34_v20, %v33_v19  ;;  %v298_v26 = vld [vmem:[%s1519_s2 + $0x18] sm:$0xff]  ;;  %v296_v27 = vld [vmem:[%s1519_s2 + $0x8] sm:$0xff]  ;;  %v857_v28 = vpack.c.bf16 %v52_v23, %v51_v22 }
   0x8   :  { %316 = vperm.xlu1 %908, %v297_v21   ;;  %306 = vperm.xlu0 %907, %v295_v24  }
   0xd   :  { %850 = vmatpush3.bf16.xpose.msk.msra.mxu0 %vm1010_vm1, %v848_v15  ;;  %896 = vmatpush3.bf16.xpose.msk.msra.mxu1 %vm1010_vm1, %v848_v15 }
   0xe   :  { %853 = vmatprep.subr.msk.bf16.mxu0 %vm1010_vm1, %v851_v16  ;;  %889 = vmatprep.subr.msk.bf16.mxu1 %vm1010_vm1, %v851_v16 }
   0xf   :  { %10 = vsyncpa [#allocation3], 0  ;;  %321 = vperm.xlu1 %908, %v298_v26   ;;  %311 = vperm.xlu0 %907, %v296_v27   ;;  %v300_v29 = vld [vmem:[%s1519_s2 + $0x28] sm:$0xff]  ;;  %v299_v30 = vld [vmem:[%s1519_s2 + $0x20] sm:$0xff]  ;;  %v345_v2 = vlaneseq }
  0x10   :  { %v35_v31 = vld [vmem:[%s1518_s1 + $0x30] sm:$0xff]  ;;  %v36_v32 = vld [vmem:[%s1518_s1 + $0x38] sm:$0xff]  ;;  %v53_v33 = vld [vmem:[%s1518_s1 + $0xc0] sm:$0xff] }
  0x11   :  { %v54_v34 = vld [vmem:[%s1518_s1 + $0xc8] sm:$0xff]  ;;  %v860_v35 = vpack.c.bf16 %v36_v32, %v35_v31  ;;  %v302_v36 = vld [vmem:[%s1519_s2 + $0x38] sm:$0xff]  ;;  %v301_v37 = vld [vmem:[%s1519_s2 + $0x30] sm:$0xff]  ;;  %v346_v4 = vshrl.u32 %v345_v2, 7 }
  0x12   :  { %v863_v38 = vpack.c.bf16 %v54_v34, %v53_v33  ;;  %v37_v39 = vld [vmem:[%s1518_s1 + $0x40] sm:$0xff]  ;;  %v38_v40 = vld [vmem:[%s1518_s1 + $0x48] sm:$0xff]  ;;  %v55_v41 = vld [vmem:[%s1518_s1 + $0xd0] sm:$0xff] }
  0x13   :  { %331 = vperm.xlu1 %908, %v300_v29   ;;  %326 = vperm.xlu0 %907, %v299_v30   ;;  %v56_v42 = vld [vmem:[%s1518_s1 + $0xd8] sm:$0xff]  ;;  %v866_v43 = vpack.c.bf16 %v38_v40, %v37_v39  ;;  %v39_v45 = vld [vmem:[%s1518_s1 + $0x50] sm:$0xff]  ;;  %v57_v47 = vld [vmem:[%s1518_s1 + $0xe0] sm:$0xff]  ;;  %v347_v5 = vsub.s32 0, %v346_v4  ;;  %v351_v7 = vsub.s32 1, %v346_v4 }
  0x14   :  { %v869_v44 = vpack.c.bf16 %v56_v42, %v55_v41  ;;  %v40_v46 = vld [vmem:[%s1518_s1 + $0x58] sm:$0xff]  ;;  %v58_v48 = vld [vmem:[%s1518_s1 + $0xe8] sm:$0xff]  ;;  %v41_v51 = vld [vmem:[%s1518_s1 + $0x60] sm:$0xff] }
  0x15   :  { %856 = vmatpush3.bf16.xpose.msk.msra.mxu0 %vm1010_vm1, %v854_v25  ;;  %897 = vmatpush3.bf16.xpose.msk.msra.mxu1 %vm1010_vm1, %v854_v25  ;;  %v872_v49 = vpack.c.bf16 %v40_v46, %v39_v45  ;;  %v875_v50 = vpack.c.bf16 %v58_v48, %v57_v47  ;;  %v42_v52 = vld [vmem:[%s1518_s1 + $0x68] sm:$0xff]  ;;  %v59_v53 = vld [vmem:[%s1518_s1 + $0xf0] sm:$0xff]  ;;  %v60_v54 = vld [vmem:[%s1518_s1 + $0xf8] sm:$0xff] }
  0x16   :  { %859 = vmatprep.subr.msk.bf16.mxu0 %vm1010_vm1, %v857_v28  ;;  %890 = vmatprep.subr.msk.bf16.mxu1 %vm1010_vm1, %v857_v28  ;;  %v878_v55 = vpack.c.bf16 %v42_v52, %v41_v51  ;;  %v881_v56 = vpack.c.bf16 %v60_v54, %v59_v53  ;;  %v43_v57 = vld [vmem:[%s1518_s1 + $0x70] sm:$0xff]  ;;  %v44_v58 = vld [vmem:[%s1518_s1 + $0x78] sm:$0xff]  ;;  %v22_v60 = vld [vmem:[%s1517_s0 + $0x8] sm:$0xff] }
  0x17   :  { %341 = vperm.xlu1 %908, %v302_v36   ;;  %336 = vperm.xlu0 %907, %v301_v37   ;;  %v884_v59 = vpack.c.bf16 %v44_v58, %v43_v57  ;;  %v26_v61 = vld [vmem:[%s1517_s0 + $0x28] sm:$0xff]  ;;  %v23_v62 = vld [vmem:[%s1517_s0 + $0x10] sm:$0xff]  ;;  %v24_v0 = vld [vmem:[%s1517_s0 + $0x18] sm:$0xff] }
  0x18   :  { %v27_v63 = vld [vmem:[%s1517_s0 + $0x30] sm:$0xff]  ;;  %v28_v1 = vld [vmem:[%s1517_s0 + $0x38] sm:$0xff]  ;;  %v303_v6 = vld [vmem:[%s1520_s3] sm:$0x3] }
  0x19   :  { %v1240_v10 = vrot.slane %v303_v6, %v347_v5  ;;  %v1242_v11 = vrot.slane %v303_v6, %v351_v7  ;;  %v691_v26 = vld [vmem:[%s1521_s4] sm:$0x3]  ;;  %s966_s4 = smov [#allocation2]  }
  0x1a   :  { %v1257_v37 = vrot.slane %v691_v26, %v347_v5  ;;  %v1264_v46 = vrot.slane %v691_v26, %v351_v7  ;;  %s740_s13 = sshll.u32 %s966_s4, 4  ;;  %s741_s13 = int_to_ptr.vmem [resolvable:$true] %s740_s13 }
  0x1b   :  { %s941_s14 = scalar_lea.vmem %s741_s13, 2048  ;;  %p946_p1 = scmp.lt.s32.totalorder %s741_s13, %s741_s13 }
  0x1c   :  { %p942_p0 = scmp.ne.s32.totalorder %s741_s13, %s941_s14  ;;  %p947_p2 = scmp.lt.s32.totalorder %s941_s14, %s941_s14 }
  0x1d   :  { %862 = vmatpush3.bf16.xpose.msk.msra.mxu0 %vm1010_vm1, %v860_v35  ;;  %898 = vmatpush3.bf16.xpose.msk.msra.mxu1 %vm1010_vm1, %v860_v35 }
  0x1e   :  { %865 = vmatprep.subr.msk.bf16.mxu0 %vm1010_vm1, %v863_v38  ;;  %891 = vmatprep.subr.msk.bf16.mxu1 %vm1010_vm1, %v863_v38  ;;  %p948_p3 = por %p947_p2, %p946_p1 }
  0x20   :  { %p949_p4 = pnand %p948_p3, %p942_p0 }
  0x25   :  { %868 = vmatpush3.bf16.xpose.msk.msra.mxu0 %vm1010_vm1, %v866_v43  ;;  %899 = vmatpush3.bf16.xpose.msk.msra.mxu1 %vm1010_vm1, %v866_v43 }
  0x26   :  { %871 = vmatprep.subr.msk.bf16.mxu0 %vm1010_vm1, %v869_v44  ;;  %892 = vmatprep.subr.msk.bf16.mxu1 %vm1010_vm1, %v869_v44 }
  0x2d   :  { %874 = vmatpush3.bf16.xpose.msk.msra.mxu0 %vm1010_vm1, %v872_v49  ;;  %900 = vmatpush3.bf16.xpose.msk.msra.mxu1 %vm1010_vm1, %v872_v49 }
  0x2e   :  { %877 = vmatprep.subr.msk.bf16.mxu0 %vm1010_vm1, %v875_v50  ;;  %893 = vmatprep.subr.msk.bf16.mxu1 %vm1010_vm1, %v875_v50 }
  0x35   :  { %880 = vmatpush3.bf16.xpose.msk.msra.mxu0 %vm1010_vm1, %v878_v55  ;;  %901 = vmatpush3.bf16.xpose.msk.msra.mxu1 %vm1010_vm1, %v878_v55 }
  0x36   :  { %883 = vmatprep.subr.msk.bf16.mxu0 %vm1010_vm1, %v881_v56  ;;  %894 = vmatprep.subr.msk.bf16.mxu1 %vm1010_vm1, %v881_v56 }
  0x3d   :  { %886 = vmatpush3.bf16.xpose.msk.msra.mxu0 %vm1010_vm1, %v884_v59  ;;  %902 = vmatpush3.bf16.xpose.msk.msra.mxu1 %vm1010_vm1, %v884_v59 }
  0x44   :  { %824 = vmatmul.mubr.msk.f32.vlgmr.msra.gmra.mrb[0].mxu0 %vm61_vm0, %v1050_v17  ;;  %832 = vmatmul.mubr.msk.f32.vlgmr.msra.gmra.mrb[0].mxu1 %vm61_vm0, %v1055_v18 }
  0x45   :  { %825 = vmatprep.mubr.msk.f32.mxu0 %vm61_vm0, %v22_v60  ;;  %833 = vmatprep.mubr.msk.f32.mxu1 %vm61_vm0, %v26_v61 }
  0x48   :  { %826 = vmatmul.mubr.msk.f32.gmra.mrb[2].mxu0 %vm61_vm0, %v22_v60  ;;  %834 = vmatmul.mubr.msk.f32.gmra.mrb[2].mxu1 %vm61_vm0, %v26_v61 }
  0x49   :  { %827 = vmatprep.mubr.msk.f32.mxu0 %vm61_vm0, %v23_v62  ;;  %835 = vmatprep.mubr.msk.f32.mxu1 %vm61_vm0, %v27_v63 }
  0x4c   :  { %828 = vmatmul.mubr.msk.f32.gmra.mrb[4].mxu0 %vm61_vm0, %v23_v62  ;;  %836 = vmatmul.mubr.msk.f32.gmra.mrb[4].mxu1 %vm61_vm0, %v27_v63 }
  0x4d   :  { %829 = vmatprep.mubr.msk.f32.mxu0 %vm61_vm0, %v24_v0  ;;  %837 = vmatprep.mubr.msk.f32.mxu1 %vm61_vm0, %v28_v1 }
  0x50   :  { %830 = vmatmul.mubr.msk.f32.gmra.mrb[6].mxu0 %vm61_vm0, %v24_v0  ;;  %838 = vmatmul.mubr.msk.f32.gmra.mrb[6].mxu1 %vm61_vm0, %v28_v1 }
  0x87   :  { %v307_v3 = vpop.permute.xlu0 %306  ;;  %v317_v9 = vpop.permute.xlu1 %316 }
  0x88   :  { %v355_v13 = vadd.f32 %v1240_v10, %v307_v3  ;;  %v356_v16 = vadd.f32 %v1242_v11, %v307_v3  ;;  %v359_v47 = vadd.f32 %v1240_v10, %v317_v9  ;;  %v360_v56 = vadd.f32 %v1242_v11, %v317_v9 }
  0x8e   :  { %v312_v8 = vpop.permute.xlu0 %311  ;;  %v1245_v14 = vpop.permute.xlu1 %321 }
  0x8f   :  { %v357_v48 = vadd.f32 %v1240_v10, %v312_v8  ;;  %v358_v51 = vadd.f32 %v1242_v11, %v312_v8 }
  0x92   :  { %v327_v12 = vpop.permute.xlu0 %326  ;;  %v332_v41 = vpop.permute.xlu1 %331 }
  0x93   :  { %v363_v15 = vadd.f32 %v1240_v10, %v327_v12  ;;  %v364_v17 = vadd.f32 %v1242_v11, %v327_v12  ;;  %v365_v52 = vadd.f32 %v1240_v10, %v332_v41  ;;  %v366_v53 = vadd.f32 %v1242_v11, %v332_v41 }
  0x96   :  { %v337_v42 = vpop.permute.xlu0 %336 }
  0x97   :  { %v367_v57 = vadd.f32 %v1240_v10, %v337_v42  ;;  %v1276_v58 = vadd.f32 %v1242_v11, %v337_v42 }
 0x117   :  { %v248_v18 = vpop.f32.mrb[0].mxu0  ;;  %v272_v19 = vpop.f32.mrb[0].mxu1 }
 0x118   :  { %v371_v20 = vmul.f32 2.0, %v248_v18  ;;  %v379_v21 = vmul.f32 2.0, %v272_v19  ;;  %v250_v22 = vpop.f32.mrb[1].mxu0  ;;  %v274_v23 = vpop.f32.mrb[1].mxu1 }
 0x119   :  { %v372_v24 = vmul.f32 2.0, %v250_v22  ;;  %v380_v25 = vmul.f32 2.0, %v274_v23 }
 0x11a   :  { %v387_v27 = vsub.f32 %v355_v13, %v371_v20  ;;  %v395_v28 = vsub.f32 %v363_v15, %v379_v21 }
 0x11b   :  { %v388_v29 = vsub.f32 %v356_v16, %v372_v24  ;;  %v396_v30 = vsub.f32 %v364_v17, %v380_v25  ;;  %v254_v31 = vpop.f32.mrb[2].mxu0  ;;  %v278_v32 = vpop.f32.mrb[2].mxu1 }
 0x11c   :  { %v1253_v33 = vmax.f32 %v387_v27, 0.0  ;;  %v1255_v34 = vmax.f32 %v395_v28, 0.0  ;;  %v256_v35 = vpop.f32.mrb[3].mxu0  ;;  %v280_v36 = vpop.f32.mrb[3].mxu1  ;;  %v373_v40 = vmul.f32 2.0, %v254_v31  ;;  %v381_v43 = vmul.f32 2.0, %v278_v32 }
 0x11d   :  { %v1259_v38 = vmax.f32 %v388_v29, 0.0  ;;  %v1261_v39 = vmax.f32 %v396_v30, 0.0  ;;  %v374_v44 = vmul.f32 2.0, %v256_v35  ;;  %v382_v45 = vmul.f32 2.0, %v280_v36 }
 0x11e   :  { %909 = vrsqrt.f32 %v1253_v33  ;;  %vm421_vm2 = vcmp.eq.f32.partialorder %v1253_v33, inf  ;;  %v389_v59 = vsub.f32 %v357_v48, %v373_v40  ;;  %v397_v60 = vsub.f32 %v365_v52, %v381_v43 }
 0x11f   :  { %911 = vrsqrt.f32 %v1255_v34  ;;  %v260_v49 = vpop.f32.mrb[4].mxu0  ;;  %v284_v50 = vpop.f32.mrb[4].mxu1  ;;  %v390_v61 = vsub.f32 %v358_v51, %v374_v44  ;;  %v398_v62 = vsub.f32 %v366_v53, %v382_v45  ;;  %vm423_vm3 = vcmp.eq.f32.partialorder %v1253_v33, 0.0 }
 0x120   :  { %913 = vrsqrt.f32 %v1259_v38  ;;  %v262_v54 = vpop.f32.mrb[5].mxu0  ;;  %v286_v55 = vpop.f32.mrb[5].mxu1  ;;  %v424_v63 = vand.u32 2147483648, %v1253_v33  ;;  %v375_v0 = vmul.f32 2.0, %v260_v49  ;;  %v383_v1 = vmul.f32 2.0, %v284_v50 }
 0x121   :  { %915 = vrsqrt.f32 %v1261_v39  ;;  %v376_v2 = vmul.f32 2.0, %v262_v54  ;;  %vm477_vm4 = vcmp.eq.f32.partialorder %v1255_v34, inf  ;;  %v1287_v5 = vmax.f32 %v389_v59, 0.0 }
 0x122   :  { %v1289_v6 = vmax.f32 %v397_v60, 0.0  ;;  %v1291_v7 = vmul.f32 2.0, %v286_v55  ;;  %vm479_vm5 = vcmp.eq.f32.partialorder %v1255_v34, 0.0  ;;  %v480_v12 = vand.u32 2147483648, %v1255_v34 }
 0x123   :  { %v1282_v3 = vpop.f32.mrb[6].mxu0  ;;  %v1284_v4 = vpop.f32.mrb[6].mxu1  ;;  %vm428_vm6 = vcmp.eq.f32.partialorder %v1259_v38, inf  ;;  %v1300_v13 = vmax.f32 %v390_v61, 0.0  ;;  %vm430_vm7 = vcmp.eq.f32.partialorder %v1259_v38, 0.0  ;;  %v431_v15 = vand.u32 2147483648, %v1259_v38 }
 0x124   :  { %v1293_v8 = vpop.f32.mrb[7].mxu0  ;;  %v1295_v9 = vpop.f32.mrb[7].mxu1  ;;  %v1304_v16 = vmax.f32 %v398_v62, 0.0  ;;  %v391_v17 = vsub.f32 %v359_v47, %v375_v0  ;;  %vm484_vm8 = vcmp.eq.f32.partialorder %v1261_v39, inf  ;;  %917 = vrsqrt.f32 %v1287_v5 }
 0x125   :  { %v399_v18 = vsub.f32 %v367_v57, %v383_v1  ;;  %v392_v19 = vsub.f32 %v360_v56, %v376_v2  ;;  %vm486_vm9 = vcmp.eq.f32.partialorder %v1261_v39, 0.0  ;;  %v487_v21 = vand.u32 2147483648, %v1261_v39 }
 0x126   :  { %v438_v22 = vand.u32 2147483648, %v1287_v5  ;;  %919 = vrsqrt.f32 %v1289_v6  ;;  %v400_v23 = vsub.f32 %v1276_v58, %v1291_v7  ;;  %v494_v26 = vand.u32 2147483648, %v1289_v6 }
 0x127   :  { %921 = vrsqrt.f32 %v1300_v13  ;;  %v445_v27 = vand.u32 2147483648, %v1300_v13  ;;  %v501_v30 = vand.u32 2147483648, %v1304_v16  ;;  %v1321_v31 = vmax.f32 %v391_v17, 0.0 }
 0x128   :  { %v910_v20 = vpop.eup %909  ;;  %923 = vrsqrt.f32 %v1304_v16  ;;  %v1327_v40 = vmax.f32 %v399_v18, 0.0  ;;  %v1329_v41 = vmax.f32 %v392_v19, 0.0  ;;  %vm435_vm10 = vcmp.eq.f32.partialorder %v1287_v5, inf }
 0x129   :  { %v912_v24 = vpop.eup %911  ;;  %v420_v25 = vmul.f32 %v910_v20, %v1253_v33  ;;  %925 = vrsqrt.f32 %v1321_v31  ;;  %vm437_vm11 = vcmp.eq.f32.partialorder %v1287_v5, 0.0  ;;  %vm491_vm12 = vcmp.eq.f32.partialorder %v1289_v6, inf }
 0x12a   :  { %v914_v28 = vpop.eup %913  ;;  %v476_v29 = vmul.f32 %v912_v24, %v1255_v34  ;;  %vm493_vm13 = vcmp.eq.f32.partialorder %v1289_v6, 0.0  ;;  %vm442_vm14 = vcmp.eq.f32.partialorder %v1300_v13, inf  ;;  %vm444_vm15 = vcmp.eq.f32.partialorder %v1300_v13, 0.0 }
 0x12b   :  { %v916_v32 = vpop.eup %915  ;;  %v422_v35 = vsel %vm421_vm2, %v1253_v33, %v420_v25  ;;  %v427_v36 = vmul.f32 %v914_v28, %v1259_v38  ;;  %vm498_vm0 = vcmp.eq.f32.partialorder %v1304_v16, inf  ;;  %vm500_vm1 = vcmp.eq.f32.partialorder %v1304_v16, 0.0 }
 0x12c   :  { %v425_v42 = vsel %vm423_vm3, %v424_v63, %v422_v35  ;;  %v478_v43 = vsel %vm477_vm4, %v1255_v34, %v476_v29  ;;  %v483_v44 = vmul.f32 %v916_v32, %v1261_v39  ;;  %vm449_vm2 = vcmp.eq.f32.partialorder %v1321_v31, inf }
 0x12d   :  { %v531_v45 = vsub.f32 1.0, %v425_v42  ;;  %v595_v47 = vmul.f32 35.0, %v425_v42  ;;  %v627_v48 = vmul.f32 18.0, %v425_v42  ;;  %v481_v49 = vsel %vm479_vm5, %v480_v12, %v478_v43 }
 0x12e   :  { %v539_v50 = vsub.f32 1.0, %v481_v49  ;;  %v603_v51 = vmul.f32 35.0, %v481_v49  ;;  %v635_v52 = vmul.f32 18.0, %v481_v49  ;;  %v429_v33 = vsel %vm428_vm6, %v1259_v38, %v427_v36  ;;  %v918_v61 = vpop.eup %917 }
 0x12f   :  { %v547_v53 = vmul.f32 %v531_v45, %v531_v45  ;;  %v611_v54 = vmul.f32 %v595_v47, %v425_v42  ;;  %v432_v55 = vsel %vm430_vm7, %v431_v15, %v429_v33  ;;  %v485_v56 = vsel %vm484_vm8, %v1261_v39, %v483_v44 }
 0x130   :  { %v555_v34 = vmul.f32 %v539_v50, %v539_v50  ;;  %v619_v57 = vmul.f32 %v603_v51, %v481_v49  ;;  %v532_v59 = vsub.f32 1.0, %v432_v55  ;;  %v596_v60 = vmul.f32 35.0, %v432_v55  ;;  %v920_v1 = vpop.eup %919 }
 0x131   :  { %v563_v62 = vmul.f32 %v547_v53, %v547_v53  ;;  %v643_v63 = vadd.f32 %v627_v48, %v611_v54  ;;  %v628_v0 = vmul.f32 18.0, %v432_v55  ;;  %v488_v38 = vsel %vm486_vm9, %v487_v21, %v485_v56  ;;  %v922_v18 = vpop.eup %921 }
 0x132   :  { %v571_v2 = vmul.f32 %v555_v34, %v555_v34  ;;  %v651_v12 = vadd.f32 %v635_v52, %v619_v57  ;;  %v548_v15 = vmul.f32 %v532_v59, %v532_v59  ;;  %v612_v17 = vmul.f32 %v596_v60, %v432_v55  ;;  %v924_v28 = vpop.eup %923 }
 0x133   :  { %v579_v19 = vmul.f32 %v563_v62, %v547_v53  ;;  %v659_v20 = vadd.f32 3.0, %v643_v63  ;;  %v540_v24 = vsub.f32 1.0, %v488_v38  ;;  %v604_v25 = vmul.f32 35.0, %v488_v38  ;;  %v1357_v44 = vpop.eup %925 }
 0x134   :  { %v587_v29 = vmul.f32 %v571_v2, %v555_v34  ;;  %v667_v32 = vadd.f32 3.0, %v651_v12  ;;  %v564_v35 = vmul.f32 %v548_v15, %v548_v15  ;;  %v644_v39 = vadd.f32 %v628_v0, %v612_v17 }
 0x135   :  { %v675_v21 = vmul.f32 %v659_v20, %v579_v19  ;;  %v556_v36 = vmul.f32 %v540_v24, %v540_v24  ;;  %v620_v42 = vmul.f32 %v604_v25, %v488_v38  ;;  %v636_v43 = vmul.f32 18.0, %v488_v38 }
 0x136   :  { %v683_v45 = vmul.f32 %v667_v32, %v587_v29  ;;  %v580_v47 = vmul.f32 %v564_v35, %v548_v15  ;;  %v660_v48 = vadd.f32 3.0, %v644_v39  ;;  %v434_v49 = vmul.f32 %v918_v61, %v1287_v5 }
 0x137   :  { %v703_v50 = vmul.f32 %v1257_v37, %v675_v21  ;;  %v572_v51 = vmul.f32 %v556_v36, %v556_v36  ;;  %v652_v52 = vadd.f32 %v636_v43, %v620_v42  ;;  %v490_v33 = vmul.f32 %v920_v1, %v1289_v6 }
 0x138   :  { %v711_v53 = vmul.f32 %v1257_v37, %v683_v45  ;;  %v676_v54 = vmul.f32 %v660_v48, %v580_v47  ;;  %v436_v55 = vsel %vm435_vm10, %v1287_v5, %v434_v49  ;;  %v441_v56 = vmul.f32 %v922_v18, %v1300_v13 }
 0x139   :  { %719 = vst [vmem:[#allocation2] sm:$0xff] %v703_v50  ;;  %v588_v34 = vmul.f32 %v572_v51, %v556_v36  ;;  %v668_v57 = vadd.f32 3.0, %v652_v52  ;;  %v439_v59 = vsel %vm437_vm11, %v438_v22, %v436_v55  ;;  %v492_v60 = vsel %vm491_vm12, %v1289_v6, %v490_v33 }
 0x13a   :  { %727 = vst [vmem:[#allocation2 + $0x40] sm:$0xff] %v711_v53  ;;  %v704_v61 = vmul.f32 %v1264_v46, %v676_v54  ;;  %v533_v62 = vsub.f32 1.0, %v439_v59  ;;  %v597_v63 = vmul.f32 35.0, %v439_v59  ;;  %v629_v0 = vmul.f32 18.0, %v439_v59 }
 0x13b   :  { %v684_v38 = vmul.f32 %v668_v57, %v588_v34  ;;  %v495_v1 = vsel %vm493_vm13, %v494_v26, %v492_v60  ;;  %v443_v5 = vsel %vm442_vm14, %v1300_v13, %v441_v56  ;;  %v497_v22 = vmul.f32 %v924_v28, %v1304_v16 }
 0x13c   :  { %720 = vst [vmem:[#allocation2 + $0x8] sm:$0xff] %v704_v61  ;;  %v549_v2 = vmul.f32 %v533_v62, %v533_v62  ;;  %v613_v12 = vmul.f32 %v597_v63, %v439_v59  ;;  %v541_v15 = vsub.f32 1.0, %v495_v1  ;;  %v605_v17 = vmul.f32 35.0, %v495_v1 }
 0x13d   :  { %v712_v18 = vmul.f32 %v1264_v46, %v684_v38  ;;  %v637_v19 = vmul.f32 18.0, %v495_v1  ;;  %v446_v6 = vsel %vm444_vm15, %v445_v27, %v443_v5  ;;  %v499_v26 = vsel %vm498_vm0, %v1304_v16, %v497_v22  ;;  %v342_v5 = vpop.permute.xlu1 %341 }
 0x13e   :  { %v565_v20 = vmul.f32 %v549_v2, %v549_v2  ;;  %v645_v24 = vadd.f32 %v629_v0, %v613_v12  ;;  %v557_v25 = vmul.f32 %v541_v15, %v541_v15  ;;  %v621_v28 = vmul.f32 %v605_v17, %v495_v1 }
 0x13f   :  { %728 = vst [vmem:[#allocation2 + $0x48] sm:$0xff] %v712_v18  ;;  %v534_v29 = vsub.f32 1.0, %v446_v6  ;;  %v598_v32 = vmul.f32 35.0, %v446_v6  ;;  %v630_v35 = vmul.f32 18.0, %v446_v6  ;;  %v502_v39 = vsel %vm500_vm1, %v501_v30, %v499_v26 }
 0x140   :  { %v581_v21 = vmul.f32 %v565_v20, %v549_v2  ;;  %v661_v13 = vadd.f32 3.0, %v645_v24  ;;  %v573_v27 = vmul.f32 %v557_v25, %v557_v25  ;;  %v653_v36 = vadd.f32 %v637_v19, %v621_v28 }
 0x141   :  { %v550_v42 = vmul.f32 %v534_v29, %v534_v29  ;;  %v614_v43 = vmul.f32 %v598_v32, %v446_v6  ;;  %v542_v45 = vsub.f32 1.0, %v502_v39  ;;  %v606_v47 = vmul.f32 35.0, %v502_v39 }
 0x142   :  { %v677_v48 = vmul.f32 %v661_v13, %v581_v21  ;;  %v589_v49 = vmul.f32 %v573_v27, %v557_v25  ;;  %v669_v50 = vadd.f32 3.0, %v653_v36  ;;  %v638_v51 = vmul.f32 18.0, %v502_v39 }
 0x143   :  { %v566_v52 = vmul.f32 %v550_v42, %v550_v42  ;;  %v646_v33 = vadd.f32 %v630_v35, %v614_v43  ;;  %v558_v53 = vmul.f32 %v542_v45, %v542_v45  ;;  %v622_v54 = vmul.f32 %v606_v47, %v502_v39 }
 0x144   :  { %v705_v55 = vmul.f32 %v1257_v37, %v677_v48  ;;  %v685_v16 = vmul.f32 %v669_v50, %v589_v49  ;;  %v448_v30 = vmul.f32 %v1357_v44, %v1321_v31  ;;  %vm451_vm3 = vcmp.eq.f32.partialorder %v1321_v31, 0.0 }
 0x145   :  { %v582_v56 = vmul.f32 %v566_v52, %v550_v42  ;;  %v662_v34 = vadd.f32 3.0, %v646_v33  ;;  %v574_v57 = vmul.f32 %v558_v53, %v558_v53  ;;  %v654_v59 = vadd.f32 %v638_v51, %v622_v54 }
 0x146   :  { %721 = vst [vmem:[#allocation2 + $0x10] sm:$0xff] %v705_v55  ;;  %v713_v60 = vmul.f32 %v1257_v37, %v685_v16  ;;  %v450_v61 = vsel %vm449_vm2, %v1321_v31, %v448_v30  ;;  %v452_v62 = vand.u32 2147483648, %v1321_v31  ;;  %927 = vrsqrt.f32 %v1327_v40 }
 0x147   :  { %v678_v63 = vmul.f32 %v662_v34, %v582_v56  ;;  %v590_v0 = vmul.f32 %v574_v57, %v558_v53  ;;  %v670_v38 = vadd.f32 3.0, %v654_v59  ;;  %v1408_v1 = vmax.f32 %v400_v23, 0.0 }
 0x148   :  { %729 = vst [vmem:[#allocation2 + $0x50] sm:$0xff] %v713_v60  ;;  %v453_v44 = vsel %vm451_vm3, %v452_v62, %v450_v61  ;;  %929 = vrsqrt.f32 %v1329_v41  ;;  %v361_v6 = vadd.f32 %v1240_v10, %v1245_v14  ;;  %v369_v58 = vadd.f32 %v1240_v10, %v342_v5 }
 0x149   :  { %v706_v22 = vmul.f32 %v1264_v46, %v678_v63  ;;  %v686_v2 = vmul.f32 %v670_v38, %v590_v0  ;;  %v535_v12 = vsub.f32 1.0, %v453_v44  ;;  %v599_v15 = vmul.f32 35.0, %v453_v44 }
 0x14a   :  { %v631_v19 = vmul.f32 18.0, %v453_v44  ;;  %931 = vrsqrt.f32 %v1408_v1  ;;  %v377_v26 = vmul.f32 2.0, %v1282_v3  ;;  %v385_v20 = vmul.f32 2.0, %v1284_v4 }
 0x14b   :  { %722 = vst [vmem:[#allocation2 + $0x18] sm:$0xff] %v706_v22  ;;  %v714_v31 = vmul.f32 %v1264_v46, %v686_v2  ;;  %v551_v17 = vmul.f32 %v535_v12, %v535_v12  ;;  %v615_v18 = vmul.f32 %v599_v15, %v453_v44  ;;  %v362_v24 = vadd.f32 %v1242_v11, %v1245_v14 }
 0x14c   :  { %v378_v25 = vmul.f32 2.0, %v1293_v8  ;;  %v386_v28 = vmul.f32 2.0, %v1295_v9  ;;  %v393_v35 = vsub.f32 %v361_v6, %v377_v26  ;;  %v401_v10 = vsub.f32 %v369_v58, %v385_v20 }
 0x14d   :  { %730 = vst [vmem:[#allocation2 + $0x58] sm:$0xff] %v714_v31  ;;  %v567_v7 = vmul.f32 %v551_v17, %v551_v17  ;;  %v647_v23 = vadd.f32 %v631_v19, %v615_v18  ;;  %v370_v39 = vadd.f32 %v1242_v11, %v342_v5  ;;  %vm505_vm4 = vcmp.eq.f32.partialorder %v1327_v40, inf }
 0x14e   :  { %v394_v21 = vsub.f32 %v362_v24, %v378_v25  ;;  %vm507_vm5 = vcmp.eq.f32.partialorder %v1327_v40, 0.0  ;;  %v1426_v4 = vmax.f32 %v393_v35, 0.0  ;;  %v1428_v14 = vmax.f32 %v401_v10, 0.0 }
 0x14f   :  { %v583_v29 = vmul.f32 %v567_v7, %v551_v17  ;;  %v663_v32 = vadd.f32 3.0, %v647_v23  ;;  %v508_v9 = vand.u32 2147483648, %v1327_v40  ;;  %v402_v36 = vsub.f32 %v370_v39, %v386_v28 }
 0x150   :  { %v928_v13 = vpop.eup %927  ;;  %v1432_v27 = vmax.f32 %v394_v21, 0.0  ;;  %vm456_vm6 = vcmp.eq.f32.partialorder %v1329_v41, inf  ;;  %vm458_vm7 = vcmp.eq.f32.partialorder %v1329_v41, 0.0  ;;  %933 = vrsqrt.f32 %v1426_v4 }
 0x151   :  { %v679_v3 = vmul.f32 %v663_v32, %v583_v29  ;;  %v504_v8 = vmul.f32 %v928_v13, %v1327_v40  ;;  %v459_v45 = vand.u32 2147483648, %v1329_v41  ;;  %vm512_vm8 = vcmp.eq.f32.partialorder %v1408_v1, inf }
 0x152   :  { %v930_v42 = vpop.eup %929  ;;  %935 = vrsqrt.f32 %v1428_v14  ;;  %vm514_vm9 = vcmp.eq.f32.partialorder %v1408_v1, 0.0  ;;  %v515_v49 = vand.u32 2147483648, %v1408_v1  ;;  %v1450_v33 = vmax.f32 %v402_v36, 0.0 }
 0x153   :  { %v707_v11 = vmul.f32 %v1257_v37, %v679_v3  ;;  %v506_v43 = vsel %vm505_vm4, %v1327_v40, %v504_v8  ;;  %v455_v48 = vmul.f32 %v930_v42, %v1329_v41  ;;  %937 = vrsqrt.f32 %v1432_v27 }
 0x154   :  { %v509_v47 = vsel %vm507_vm5, %v508_v9, %v506_v43  ;;  %v932_v50 = vpop.eup %931  ;;  %vm463_vm10 = vcmp.eq.f32.partialorder %v1426_v4, inf  ;;  %v466_v54 = vand.u32 2147483648, %v1426_v4  ;;  %v522_v55 = vand.u32 2147483648, %v1428_v14 }
 0x155   :  { %723 = vst [vmem:[#allocation2 + $0x20] sm:$0xff] %v707_v11  ;;  %v543_v51 = vsub.f32 1.0, %v509_v47  ;;  %v607_v52 = vmul.f32 35.0, %v509_v47  ;;  %v457_v53 = vsel %vm456_vm6, %v1329_v41, %v455_v48  ;;  %v511_v40 = vmul.f32 %v932_v50, %v1408_v1 }
 0x156   :  { %v639_v56 = vmul.f32 18.0, %v509_v47  ;;  %v460_v34 = vsel %vm458_vm7, %v459_v45, %v457_v53  ;;  %vm465_vm11 = vcmp.eq.f32.partialorder %v1426_v4, 0.0  ;;  %vm519_vm12 = vcmp.eq.f32.partialorder %v1428_v14, inf }
 0x157   :  { %v559_v16 = vmul.f32 %v543_v51, %v543_v51  ;;  %v623_v30 = vmul.f32 %v607_v52, %v509_v47  ;;  %v536_v57 = vsub.f32 1.0, %v460_v34  ;;  %v600_v59 = vmul.f32 35.0, %v460_v34 }
 0x158   :  { %v632_v60 = vmul.f32 18.0, %v460_v34  ;;  %v513_v61 = vsel %vm512_vm8, %v1408_v1, %v511_v40  ;;  %vm521_vm13 = vcmp.eq.f32.partialorder %v1428_v14, 0.0  ;;  %939 = vrsqrt.f32 %v1450_v33 }
 0x159   :  { %v575_v62 = vmul.f32 %v559_v16, %v559_v16  ;;  %v655_v63 = vadd.f32 %v639_v56, %v623_v30  ;;  %v516_v0 = vsel %vm514_vm9, %v515_v49, %v513_v61  ;;  %v552_v41 = vmul.f32 %v536_v57, %v536_v57 }
 0x15a   :  { %v616_v38 = vmul.f32 %v600_v59, %v460_v34  ;;  %v544_v44 = vsub.f32 1.0, %v516_v0  ;;  %v608_v5 = vmul.f32 35.0, %v516_v0  ;;  %v640_v12 = vmul.f32 18.0, %v516_v0  ;;  %v934_v15 = vpop.eup %933 }
 0x15b   :  { %v591_v22 = vmul.f32 %v575_v62, %v559_v16  ;;  %v671_v2 = vadd.f32 3.0, %v655_v63  ;;  %vm470_vm14 = vcmp.eq.f32.partialorder %v1432_v27, inf  ;;  %v568_v31 = vmul.f32 %v552_v41, %v552_v41 }
 0x15c   :  { %v648_v17 = vadd.f32 %v632_v60, %v616_v38  ;;  %v560_v18 = vmul.f32 %v544_v44, %v544_v44  ;;  %v624_v19 = vmul.f32 %v608_v5, %v516_v0  ;;  %v936_v1 = vpop.eup %935  ;;  %v462_v58 = vmul.f32 %v934_v15, %v1426_v4 }
 0x15d   :  { %v687_v6 = vmul.f32 %v671_v2, %v591_v22  ;;  %vm472_vm15 = vcmp.eq.f32.partialorder %v1432_v27, 0.0  ;;  %v473_v7 = vand.u32 2147483648, %v1432_v27  ;;  %v584_v23 = vmul.f32 %v568_v31, %v552_v41  ;;  %v938_v25 = vpop.eup %937 }
 0x15e   :  { %v664_v26 = vadd.f32 3.0, %v648_v17  ;;  %v576_v20 = vmul.f32 %v560_v18, %v560_v18  ;;  %v656_v24 = vadd.f32 %v640_v12, %v624_v19  ;;  %v464_v29 = vsel %vm463_vm10, %v1426_v4, %v462_v58 }
 0x15f   :  { %v715_v28 = vmul.f32 %v1257_v37, %v687_v6  ;;  %v518_v32 = vmul.f32 %v936_v1, %v1428_v14  ;;  %vm526_vm0 = vcmp.eq.f32.partialorder %v1450_v33, inf  ;;  %v467_v21 = vsel %vm465_vm11, %v466_v54, %v464_v29 }
 0x160   :  { %v680_v35 = vmul.f32 %v664_v26, %v584_v23  ;;  %v592_v10 = vmul.f32 %v576_v20, %v560_v18  ;;  %v672_v39 = vadd.f32 3.0, %v656_v24  ;;  %v537_v13 = vsub.f32 1.0, %v467_v21 }
 0x161   :  { %731 = vst [vmem:[#allocation2 + $0x60] sm:$0xff] %v715_v28  ;;  %v601_v3 = vmul.f32 35.0, %v467_v21  ;;  %v633_v8 = vmul.f32 18.0, %v467_v21  ;;  %v520_v9 = vsel %vm519_vm12, %v1428_v14, %v518_v32  ;;  %v469_v43 = vmul.f32 %v938_v25, %v1432_v27 }
 0x162   :  { %v708_v36 = vmul.f32 %v1264_v46, %v680_v35  ;;  %v688_v11 = vmul.f32 %v672_v39, %v592_v10  ;;  %v523_v42 = vsel %vm521_vm13, %v522_v55, %v520_v9  ;;  %v940_v45 = vpop.eup %939  ;;  %v553_v47 = vmul.f32 %v537_v13, %v537_v13 }
 0x163   :  { %v617_v4 = vmul.f32 %v601_v3, %v467_v21  ;;  %v545_v48 = vsub.f32 1.0, %v523_v42  ;;  %v609_v49 = vmul.f32 35.0, %v523_v42  ;;  %v641_v51 = vmul.f32 18.0, %v523_v42 }
 0x164   :  { %724 = vst [vmem:[#allocation2 + $0x28] sm:$0xff] %v708_v36  ;;  %v716_v50 = vmul.f32 %v1264_v46, %v688_v11  ;;  %v471_v52 = vsel %vm470_vm14, %v1432_v27, %v469_v43  ;;  %v525_v53 = vmul.f32 %v940_v45, %v1450_v33  ;;  %v569_v40 = vmul.f32 %v553_v47, %v553_v47 }
 0x165   :  { %v649_v14 = vadd.f32 %v633_v8, %v617_v4  ;;  %v561_v54 = vmul.f32 %v545_v48, %v545_v48  ;;  %v625_v55 = vmul.f32 %v609_v49, %v523_v42  ;;  %v474_v16 = vsel %vm472_vm15, %v473_v7, %v471_v52 }
 0x166   :  { %732 = vst [vmem:[#allocation2 + $0x68] sm:$0xff] %v716_v50  ;;  %v527_v30 = vsel %vm526_vm0, %v1450_v33, %v525_v53  ;;  %vm528_vm1 = vcmp.eq.f32.partialorder %v1450_v33, 0.0  ;;  %v529_v56 = vand.u32 2147483648, %v1450_v33  ;;  %v585_v34 = vmul.f32 %v569_v40, %v553_v47 }
 0x167   :  { %v665_v57 = vadd.f32 3.0, %v649_v14  ;;  %v577_v59 = vmul.f32 %v561_v54, %v561_v54  ;;  %v657_v60 = vadd.f32 %v641_v51, %v625_v55  ;;  %v538_v61 = vsub.f32 1.0, %v474_v16 }
 0x168   :  { %v602_v62 = vmul.f32 35.0, %v474_v16  ;;  %v530_v63 = vsel %vm528_vm1, %v529_v56, %v527_v30  ;;  %v634_v22 = vmul.f32 18.0, %v474_v16 }
 0x169   :  { %v681_v0 = vmul.f32 %v665_v57, %v585_v34  ;;  %v593_v41 = vmul.f32 %v577_v59, %v561_v54  ;;  %v673_v38 = vadd.f32 3.0, %v657_v60  ;;  %v546_v27 = vsub.f32 1.0, %v530_v63 }
 0x16a   :  { %v554_v44 = vmul.f32 %v538_v61, %v538_v61  ;;  %v618_v5 = vmul.f32 %v602_v62, %v474_v16  ;;  %v610_v2 = vmul.f32 35.0, %v530_v63  ;;  %v642_v19 = vmul.f32 18.0, %v530_v63 }
 0x16b   :  { %v709_v12 = vmul.f32 %v1257_v37, %v681_v0  ;;  %v689_v15 = vmul.f32 %v673_v38, %v593_v41  ;;  %v562_v31 = vmul.f32 %v546_v27, %v546_v27 }
 0x16c   :  { %v570_v33 = vmul.f32 %v554_v44, %v554_v44  ;;  %v650_v17 = vadd.f32 %v634_v22, %v618_v5  ;;  %v626_v18 = vmul.f32 %v610_v2, %v530_v63 }
 0x16d   :  { %725 = vst [vmem:[#allocation2 + $0x30] sm:$0xff] %v709_v12  ;;  %v717_v1 = vmul.f32 %v1257_v37, %v689_v15  ;;  %v578_v6 = vmul.f32 %v562_v31, %v562_v31 }
 0x16e   :  { %v586_v58 = vmul.f32 %v570_v33, %v554_v44  ;;  %v666_v7 = vadd.f32 3.0, %v650_v17  ;;  %v658_v23 = vadd.f32 %v642_v19, %v626_v18 }
 0x16f   :  { %733 = vst [vmem:[#allocation2 + $0x70] sm:$0xff] %v717_v1  ;;  %v594_v26 = vmul.f32 %v578_v6, %v562_v31 }
 0x170   :  { %v682_v20 = vmul.f32 %v666_v7, %v586_v58  ;;  %v674_v24 = vadd.f32 3.0, %v658_v23 }
 0x172   :  { %v710_v25 = vmul.f32 %v1264_v46, %v682_v20  ;;  %v690_v28 = vmul.f32 %v674_v24, %v594_v26 }
 0x174   :  { %726 = vst [vmem:[#allocation2 + $0x38] sm:$0xff] %v710_v25  ;;  %v718_v29 = vmul.f32 %v1264_v46, %v690_v28 }
 0x176   :  { %734 = vst [vmem:[#allocation2 + $0x78] sm:$0xff] %v718_v29 }
 0x177   :  { %952 = shalt.err (!%p949_p4)
}
 0x178   :  { %s953_s17 = scalar_lea.hbm %s1522_s5, 2048 }
 0x179   :  { %p954_p5 = scmp.ne.s32.totalorder %s1522_s5, %s953_s17  ;;  %p957_p6 = scmp.lt.u32.totalorder %s953_s17, %s1522_s5 }
 0x17b   :  { %p959_p7 = pnand %p957_p6, %p954_p5 }
 0x17d   :  { %962 = shalt.err (!%p959_p7)
}
 0x17e   :  { %s967_s22 = smov 256   ;;  %s968_s23 = smov 16  }
 0x17f   :  { %746 = dma.vmem_to_hbm [thread:$0]  %s741_s13, 2048, %s1522_s5, [#allocation3], %s967_s22, %s967_s22, %s968_s23  }
 0x180   :  { %963 = dma.done.wait [#allocation3], 2048  }
 0x181   :  { %964 = vsyncadd [#allocation3], 4294965248 }
 0x182   :  { %750 = vsyncpa [#allocation3], 1 }

</bundles_post_ra>
